<compile_context>
chip_gen: v6e
topology: v6e:2x2x1
jax: 0.10.0
libtpu: 0.0.40
codegen_flags: <defaults>
</compile_context>

<pallas_src>
import jax
import jax.numpy as jnp
from jax.experimental import pallas as pl
from jax.experimental.pallas import tpu as pltpu


_LANES = 1024                            # 8 * 128: lane-dense, multiple of 128
_TARGET_BLOCK_BYTES = 2 * 1024 * 1024    # ~2 MiB per (double-buffered) buffer


def _identity_kernel(x_ref, o_ref):
    # Pure elementwise identity over one lane-dense (row_tile, 1024) tile.
    o_ref[...] = x_ref[...]


def glove_encoder_forward(embeddings: jax.Array) -> jax.Array:
    """Hot path of GloVeEncoder.forward: torch.nn.Identity == return input.

    No kernel is launched -- removing the HBM round trip is the single
    largest win for an identity op on every TPU generation.
    """
    return embeddings


@jax.jit
def glove_identity_copy_pallas(x: jax.Array) -> jax.Array:
    """Explicitly materialized identity copy as a Pallas TPU kernel.

    Presents the contiguous buffer as a lane-dense (rows, 1024) slab, copies
    it with multi-MiB tiles, and aliases the output onto the input so XLA can
    elide the writeback. Numerically identical to `glove_encoder_forward`.
    """
    orig_shape = x.shape
    n = x.size
    itemsize = jnp.dtype(x.dtype).itemsize

    # Row tile sized for ~2 MiB blocks; multiple of 8 sublanes.
    row_tile = max(8, _TARGET_BLOCK_BYTES // (_LANES * itemsize))
    row_tile = (row_tile // 8) * 8

    rows_needed = -(-n // _LANES)                      # cdiv(n, _LANES)
    if rows_needed <= row_tile:
        # Small input: one block covering the full array extent
        # (satisfies the (8,128) rule via the "full dims" exception).
        row_tile = rows_needed
    rows = -(-rows_needed // row_tile) * row_tile      # round up to tile mult
    n_pad = rows * _LANES

    flat = x.reshape(-1)
    if n_pad != n:
        flat = jnp.pad(flat, (0, n_pad - n))
    x2d = flat.reshape(rows, _LANES)

    spec = pl.BlockSpec((row_tile, _LANES), lambda i: (i, 0))
    out2d = pl.pallas_call(
        _identity_kernel,
        out_shape=jax.ShapeDtypeStruct((rows, _LANES), x.dtype),
        grid=(rows // row_tile,),
        in_specs=[spec],
        out_specs=spec,
        input_output_aliases={0: 0},
        compiler_params=pltpu.CompilerParams(
            dimension_semantics=("parallel",),
        ),
    )(x2d)

    return out2d.reshape(-1)[:n].reshape(orig_shape)


class GloVeEncoder:
    """Stateless JAX counterpart of the PyTorch GloVeEncoder (0 parameters)."""

    def __init__(self):
        self.output_size = [None, 50]
        self.num_parameters = 0

    def __call__(self, embeddings: jax.Array, materialize: bool = False) -> jax.Array:
        # NOTE: Python-side metadata mutation (mirrors the PyTorch module);
        # not jit/trace-safe, numerically irrelevant.
        self.output_size = [embeddings.shape[1], embeddings.shape[2]]
        if materialize:
            return glove_identity_copy_pallas(embeddings)
        return glove_encoder_forward(embeddings)


if __name__ == "__main__":
    key = jax.random.PRNGKey(0)
    B, S, D = 2, 8, 50  # (batch, seq_len, glove_dim=50)
    embeddings = jax.random.normal(key, (B, S, D), dtype=jnp.float32)

    enc = GloVeEncoder()

    # Default (recommended) path: zero-cost passthrough.
    out_fast = enc(embeddings)
    out_fast = jax.block_until_ready(out_fast)
    assert out_fast.shape == (B, S, D)
    assert out_fast.dtype == embeddings.dtype
    assert enc.output_size == [S, D]
    assert bool(jnp.all(out_fast == embeddings))

    # Pallas kernel path: explicit lane-dense, large-tile, aliased identity copy.
    out_kernel = enc(embeddings, materialize=True)
    out_kernel = jax.block_until_ready(out_kernel)
    assert out_kernel.shape == (B, S, D)
    assert out_kernel.dtype == embeddings.dtype
    assert bool(jnp.all(out_kernel == embeddings))

    print("KERNEL_OK")
</pallas_src>

<mosaic_0001>
module attributes {stable_mosaic.version = 11 : i64} {
  func.func @_identity_kernel(%arg0: i32, %arg1: memref<1x1024xf32, #tpu.memory_space<vmem>>, %arg2: memref<1x1024xf32, #tpu.memory_space<vmem>>) attributes {dimension_semantics = [#tpu.dimension_semantics<parallel>], iteration_bounds = array<i64: 1>, scalar_prefetch = 0 : i64, scratch_operands = 0 : i64, tpu.core_type = #tpu.core_type<tc>, window_params = [{transform_indices = @transform_0, window_bounds = array<i64: 1, 1024>}, {transform_indices = @transform_1, window_bounds = array<i64: 1, 1024>}]} {
    %c0 = arith.constant 0 : index
    %c0_0 = arith.constant 0 : index
    %0 = vector.load %arg1[%c0, %c0_0] : memref<1x1024xf32, #tpu.memory_space<vmem>>, vector<1x1024xf32>
    %c0_1 = arith.constant 0 : index
    %c0_2 = arith.constant 0 : index
    %1 = vector.load %arg2[%c0_1, %c0_2] : memref<1x1024xf32, #tpu.memory_space<vmem>>, vector<1x1024xf32>
    tpu.vector_store %arg2[%c0_1, %c0_2], %0 {strides = array<i32>} : memref<1x1024xf32, #tpu.memory_space<vmem>>, vector<1x1024xf32>,
    return
  }
  func.func @transform_0(%arg0: i32) -> (i32, i32) {
    %c0_i32 = arith.constant 0 : i32
    %c0_i32_0 = arith.constant 0 : i32
    return %arg0, %c0_i32 : i32, i32
  }
  func.func @transform_1(%arg0: i32) -> (i32, i32) {
    %c0_i32 = arith.constant 0 : i32
    %c0_i32_0 = arith.constant 0 : i32
    return %arg0, %c0_i32 : i32, i32
  }
}

</mosaic_0001>

<bundles_post_ra>
// kernel: glove_identity_copy_pallas.1
= control target key start
LH: loop header
LB: loop body
LE: loop exit
PB: predicated region body
PF: predicated region fallthrough
CT: control target
= control target key end

     0   :  { %s30_s0 = inlined_call_operand.vmem [shape: f32[1,1024], index: 0, kind: input, shape index: {}, may-alias: {0,1}]   ;;  %s31_s1 = inlined_call_operand.vmem [shape: f32[1,1024], index: 1, kind: output, shape index: {}, may-alias: {0,1}]  }
   0x1   :  { %v8_v0 = vld [vmem:[%s30_s0] sm:$0xff] }
   0x2   :  { %9 = vst [vmem:[%s31_s1] sm:$0xff] %v8_v0 }

</bundles_post_ra>
